<compile_context>
chip_gen: v6e
topology: v6e:2x2x1
jax: 0.10.0
libtpu: 0.0.40
codegen_flags: <defaults>
</compile_context>

<pallas_src>
import jax
import jax.numpy as jnp
from jax.experimental import pallas as pl
from jax.experimental.pallas import tpu as pltpu


# ----------------------------------------------------------------------------
# helpers
# ----------------------------------------------------------------------------
def _round_up(v, m):
    return ((v + m - 1) // m) * m


def _vmem_limit_bytes():
    """~80% of physical VMEM (~100 MiB on v5e/v6e, ~51 MiB on v7x)."""
    try:
        cap = int(pltpu.get_tpu_info().vmem_capacity_bytes)
    except Exception:
        cap = 64 * 1024 * 1024  # conservative fallback (v7x per-core size)
    return min(int(cap * 0.8), 100 * 1024 * 1024)


def _block_spec(shape, index_map, *, single_buffer=False):
    """BlockSpec; resident operands (constant index map) get a single buffer."""
    if single_buffer:
        try:
            return pl.BlockSpec(shape, index_map, pipeline_mode=pl.Buffered(1))
        except (TypeError, ValueError):
            return pl.BlockSpec(shape, index_map)
    return pl.BlockSpec(shape, index_map)


# ----------------------------------------------------------------------------
# kernels
# ----------------------------------------------------------------------------
def _quad_resident_kernel(a_ref, b_ref, xt_ref, o_ref):
    """A (already scaled by 0.5) is fully resident in VMEM.

    a_ref : (n, n)  f32    b_ref : (n, 1) f32
    xt_ref: (n, tb) f32    lane block of X^T (one batch element per lane)
    o_ref : (1, tb) f32    lane-dense outputs
    """
    xt = xt_ref[...]
    ax = jnp.dot(a_ref[...], xt, preferred_element_type=jnp.float32)  # MXU
    # fused quad + linear terms, reduced over sublanes -> lane-dense row
    o_ref[...] = jnp.sum((ax + b_ref[...]) * xt, axis=0, keepdims=True)


def _quad_streaming_kernel(a_ref, b_ref, xt_ref, o_ref):
    """A streamed in row blocks (n too large for A to stay resident).

    grid = (batch_blocks, row_blocks); row axis innermost ("arbitrary").
    a_ref : (tn, n_pad) f32 (row block of 0.5*A)   b_ref : (tn, 1) f32
    xt_ref: (n_pad, tb) f32 (resident per batch block)
    o_ref : (1, tb) f32 accumulator (same block across the row axis)
    """
    r = pl.program_id(1)
    tn = a_ref.shape[0]

    @pl.when(r == 0)
    def _():
        o_ref[...] = jnp.zeros_like(o_ref)

    xt = xt_ref[...]
    ax = jnp.dot(a_ref[...], xt, preferred_element_type=jnp.float32)  # (tn, tb)
    row0 = pl.multiple_of(r * tn, 8)
    x_rows = xt_ref[pl.ds(row0, tn), :]                               # (tn, tb)
    o_ref[...] += jnp.sum((ax + b_ref[...]) * x_rows, axis=0, keepdims=True)


# ----------------------------------------------------------------------------
# wrapper
# ----------------------------------------------------------------------------
def make_quadratic(A, b, c, *, force_stream=False, stream_tn=None, stream_tb=None):
    """Returns f(x) = 0.5 x^T A x + b^T x + c, evaluated by a Pallas TPU kernel.

    f accepts a single x of shape (n,) -> scalar (matches the torch module) or
    a batch X of shape (B, n) -> (B,) values.
    """
    A = jnp.asarray(A, jnp.float32)
    b = jnp.asarray(b, jnp.float32)
    n = int(A.shape[0])
    c_val = jnp.float32(c)

    vmem_limit = _vmem_limit_bytes()
    budget = int(vmem_limit * 0.85)          # headroom for compiler scratch
    a_bytes = n * n * 4

    # ---- choose execution mode / tile sizes (static, at closure build) -----
    # resident mode cost: A (single-buffered) + per batch column:
    #   2*n*4 (X^T double-buffer) + n*4 (A@X intermediate)
    avail = budget - a_bytes - n * 4 - (1 << 20)
    tb_cap = avail // (3 * n * 4) if avail > 0 else 0
    use_stream = force_stream or tb_cap < 128

    if not use_stream:
        tb_max = min(512, (tb_cap // 128) * 128)
        n_pad = n
        a_half = 0.5 * A                      # pre-scale once (build time)
        b_col = b.reshape(n, 1)
    else:
        # streaming mode: A row blocks (double-buffered) stream over an inner
        # grid axis, X^T block stays resident per batch block.
        if stream_tb is not None:
            tb_max = stream_tb
        else:
            tb_max = 256 if 2 * n * 256 * 4 <= budget // 2 else 128
        if stream_tn is not None:
            tn = stream_tn
        else:
            avail_s = budget - 2 * n * tb_max * 4 - (1 << 20)
            row_bytes = 2 * n * 4 + tb_max * 4 + 8
            tn = max(8, min(512, (avail_s // row_bytes) // 8 * 8))
        n_pad = _round_up(n, tn)
        a_half = jnp.zeros((n_pad, n_pad), jnp.float32).at[:n, :n].set(0.5 * A)
        b_col = jnp.zeros((n_pad, 1), jnp.float32).at[:n, 0].set(b)

    # NOTE: "parallel" only guarantees independence; guaranteed 2-core v7x
    # execution would need pltpu.CORE_PARALLEL / core_map (see TODO above).
    cparams = pltpu.CompilerParams(
        dimension_semantics=("parallel",) if not use_stream
        else ("parallel", "arbitrary"),
        vmem_limit_bytes=vmem_limit,
    )

    def _build_call(b_pad, tb):
        if not use_stream:
            grid = (b_pad // tb,)
            in_specs = [
                _block_spec((n_pad, n_pad), lambda i: (0, 0), single_buffer=True),
                _block_spec((n_pad, 1), lambda i: (0, 0), single_buffer=True),
                pl.BlockSpec((n_pad, tb), lambda i: (0, i)),
            ]
            out_specs = pl.BlockSpec((1, tb), lambda i: (0, i))
            kernel = _quad_resident_kernel
        else:
            grid = (b_pad // tb, n_pad // tn)
            in_specs = [
                pl.BlockSpec((tn, n_pad), lambda bi, ri: (ri, 0)),
                pl.BlockSpec((tn, 1), lambda bi, ri: (ri, 0)),
                pl.BlockSpec((n_pad, tb), lambda bi, ri: (0, bi)),
            ]
            out_specs = pl.BlockSpec((1, tb), lambda bi, ri: (0, bi))
            kernel = _quad_streaming_kernel
        return pl.pallas_call(
            kernel,
            out_shape=jax.ShapeDtypeStruct((1, b_pad), jnp.float32),
            grid_spec=pltpu.PrefetchScalarGridSpec(
                num_scalar_prefetch=0,
                grid=grid,
                in_specs=in_specs,
                out_specs=out_specs,
            ),
            compiler_params=cparams,
        )

    def _eval(X):
        # X: (B, n) f32 -> (B,) f32  (c added here, outside the kernel)
        B = X.shape[0]
        xt = X.T                                        # (n, B): batch -> lanes
        if n_pad != n:
            xt = jnp.pad(xt, ((0, n_pad - n), (0, 0)))
        tb = min(tb_max, _round_up(B, 128))
        b_pad = _round_up(B, tb)
        if b_pad != B:
            xt = jnp.pad(xt, ((0, 0), (0, b_pad - B)))
        out = _build_call(b_pad, tb)(a_half, b_col, xt)  # (1, b_pad) lane-dense
        return out[0, :B] + c_val

    @jax.jit
    def f(x):
        x = jnp.asarray(x, jnp.float32)
        if x.ndim == 1:
            return _eval(x.reshape(1, n))[0]            # scalar, like the torch module
        return _eval(x.reshape(-1, n))                  # batched evaluations

    return f


class Quadratic:
    """JAX/Pallas analogue of the torch Quadratic module."""

    def __init__(self, A, b, c, **make_kwargs):
        self.A = jnp.asarray(A, jnp.float32)
        self.b = jnp.asarray(b, jnp.float32)
        self.c = jnp.float32(c)
        self._f = make_quadratic(self.A, self.b, self.c, **make_kwargs)

    def forward(self, x):
        return self._f(x)

    __call__ = forward

    def x_soln(self):
        return -jnp.linalg.pinv(self.A) @ self.b

    def f_soln(self):
        return None


# ----------------------------------------------------------------------------
# self-test
# ----------------------------------------------------------------------------
def _ref_f(A, b, c, X):
    quad = 0.5 * jnp.einsum("bi,ij,bj->b", X, A, X,
                            precision=jax.lax.Precision.HIGHEST)
    lin = jnp.einsum("bi,i->b", X, b, precision=jax.lax.Precision.HIGHEST)
    return quad + lin + c


if __name__ == "__main__":
    key = jax.random.PRNGKey(0)
    k_a, k_b, k_x, k_xb, k_a2, k_b2, k_x2, k_xb2 = jax.random.split(key, 8)

    # --- path 1: A fully resident in VMEM (typical n) ------------------------
    n = 128
    M = jax.random.normal(k_a, (n, n), dtype=jnp.float32)
    A = 0.5 * (M + M.T)
    b = jax.random.normal(k_b, (n,), dtype=jnp.float32)
    c = 0.75
    quad = Quadratic(A, b, c)

    x = jax.random.normal(k_x, (n,), dtype=jnp.float32)
    out = quad(x)
    jax.block_until_ready(out)
    ref = _ref_f(A, b, c, x.reshape(1, n))[0]
    assert jnp.allclose(out, ref, rtol=2e-3, atol=1e-2), (out, ref)

    X = jax.random.normal(k_xb, (8, n), dtype=jnp.float32)
    outs = quad(X)
    jax.block_until_ready(outs)
    refs = _ref_f(A, b, c, X)
    assert jnp.allclose(outs, refs, rtol=2e-3, atol=1e-2), (outs, refs)

    # --- path 2: A streamed in row blocks (forced here at small n so the
    #     accumulation path is exercised; in production it triggers only when
    #     A no longer fits resident, at a lower n on v7x's 64 MiB VMEM) -------
    n2 = 256
    M2 = jax.random.normal(k_a2, (n2, n2), dtype=jnp.float32)
    A2 = 0.5 * (M2 + M2.T)
    b2 = jax.random.normal(k_b2, (n2,), dtype=jnp.float32)
    c2 = -1.25
    f2 = make_quadratic(A2, b2, c2, force_stream=True, stream_tn=128, stream_tb=128)

    x2 = jax.random.normal(k_x2, (n2,), dtype=jnp.float32)
    out2 = f2(x2)
    jax.block_until_ready(out2)
    ref2 = _ref_f(A2, b2, c2, x2.reshape(1, n2))[0]
    assert jnp.allclose(out2, ref2, rtol=2e-3, atol=2e-2), (out2, ref2)

    X2 = jax.random.normal(k_xb2, (4, n2), dtype=jnp.float32)
    outs2 = f2(X2)
    jax.block_until_ready(outs2)
    refs2 = _ref_f(A2, b2, c2, X2)
    assert jnp.allclose(outs2, refs2, rtol=2e-3, atol=2e-2), (outs2, refs2)

    print("KERNEL_OK")
</pallas_src>

<mosaic_0001>
module attributes {stable_mosaic.version = 11 : i64} {
  func.func @_quad_resident_kernel(%arg0: i32, %arg1: memref<128x128xf32, #tpu.memory_space<vmem>>, %arg2: memref<128x1xf32, #tpu.memory_space<vmem>>, %arg3: memref<128x128xf32, #tpu.memory_space<vmem>>, %arg4: memref<1x128xf32, #tpu.memory_space<vmem>>) attributes {dimension_semantics = [#tpu.dimension_semantics<parallel>], iteration_bounds = array<i64: 1>, scalar_prefetch = 0 : i64, scratch_operands = 0 : i64, tpu.core_type = #tpu.core_type<tc>, window_params = [{pipeline_mode = #tpu.pipeline_mode<synchronous>, transform_indices = @transform_0, window_bounds = array<i64: 128, 128>}, {pipeline_mode = #tpu.pipeline_mode<synchronous>, transform_indices = @transform_1, window_bounds = array<i64: 128, 1>}, {transform_indices = @transform_2, window_bounds = array<i64: 128, 128>}, {transform_indices = @transform_3, window_bounds = array<i64: 1, 128>}]} {
    %c0 = arith.constant 0 : index
    %c0_0 = arith.constant 0 : index
    %0 = vector.load %arg3[%c0, %c0_0] : memref<128x128xf32, #tpu.memory_space<vmem>>, vector<128x128xf32>
    %c0_1 = arith.constant 0 : index
    %c0_2 = arith.constant 0 : index
    %1 = vector.load %arg1[%c0_1, %c0_2] : memref<128x128xf32, #tpu.memory_space<vmem>>, vector<128x128xf32>
    %cst = arith.constant dense<0.000000e+00> : vector<128x128xf32>
    %2 = tpu.matmul %1, %0, %cst {dimension_numbers = #tpu.dot_dimension_numbers<[1], [0], [0], [1], [0, 0, 1, 1], [], []>} : vector<128x128xf32>, vector<128x128xf32>, vector<128x128xf32> -> vector<128x128xf32>
    %c0_3 = arith.constant 0 : index
    %c0_4 = arith.constant 0 : index
    %3 = vector.load %arg2[%c0_3, %c0_4] : memref<128x1xf32, #tpu.memory_space<vmem>>, vector<128x1xf32>
    %4 = vector.broadcast %3 : vector<128x1xf32> to vector<128x128xf32>
    %5 = arith.addf %2, %4 : vector<128x128xf32>
    %6 = arith.mulf %5, %0 : vector<128x128xf32>
    %cst_5 = arith.constant dense<0.000000e+00> : vector<128xf32>
    %7 = vector.multi_reduction <add>, %6, %cst_5 [0] : vector<128x128xf32> to vector<128xf32>
    %8 = vector.shape_cast %7 : vector<128xf32> to vector<1x128xf32>
    %c0_6 = arith.constant 0 : index
    %c0_7 = arith.constant 0 : index
    %9 = vector.load %arg4[%c0_6, %c0_7] : memref<1x128xf32, #tpu.memory_space<vmem>>, vector<1x128xf32>
    tpu.vector_store %arg4[%c0_6, %c0_7], %8 {strides = array<i32>} : memref<1x128xf32, #tpu.memory_space<vmem>>, vector<1x128xf32>,
    return
  }
  func.func @transform_0(%arg0: i32) -> (i32, i32) {
    %c0_i32 = arith.constant 0 : i32
    %c0_i32_0 = arith.constant 0 : i32
    %c0_i32_1 = arith.constant 0 : i32
    return %c0_i32, %c0_i32_0 : i32, i32
  }
  func.func @transform_1(%arg0: i32) -> (i32, i32) {
    %c0_i32 = arith.constant 0 : i32
    %c0_i32_0 = arith.constant 0 : i32
    %c0_i32_1 = arith.constant 0 : i32
    return %c0_i32, %c0_i32_0 : i32, i32
  }
  func.func @transform_2(%arg0: i32) -> (i32, i32) {
    %c0_i32 = arith.constant 0 : i32
    %c0_i32_0 = arith.constant 0 : i32
    return %c0_i32, %arg0 : i32, i32
  }
  func.func @transform_3(%arg0: i32) -> (i32, i32) {
    %c0_i32 = arith.constant 0 : i32
    %c0_i32_0 = arith.constant 0 : i32
    return %c0_i32, %arg0 : i32, i32
  }
}

</mosaic_0001>

<bundles_post_ra>
// kernel: f.1
= control target key start
LH: loop header
LB: loop body
LE: loop exit
PB: predicated region body
PF: predicated region fallthrough
CT: control target
= control target key end

     0   :  { %v452_v2 = vmov 0   ;;  %s732_s2 = inlined_call_operand.vmem [shape: f32[128,128], index: 2, kind: input, shape index: {}]   ;;  %s733_s0 = inlined_call_operand.vmem [shape: f32[128,128], index: 0, kind: input, shape index: {}]   ;;  %s734_s1 = inlined_call_operand.vmem [shape: f32[128,1], index: 1, kind: input, shape index: {}]   ;;  %s735_s3 = inlined_call_operand.vmem [shape: f32[1,128], index: 3, kind: output, shape index: {}]  }
   0x1   :  { %v476_v0 = vld [vmem:[%s732_s2 + $0x78] sm:$0xff]  ;;  %v481_v1 = vld [vmem:[%s732_s2 + $0x70] sm:$0xff]  ;;  %450 = vset.pattern.permute.xlu0 %v452_v2  ;;  %451 = vset.pattern.permute.xlu1 %v452_v2  ;;  %v490_v3 = vld [vmem:[%s732_s2 + $0x68] sm:$0xff] }
   0x2   :  { %361 = vmatprep.subr.mxu0 %v476_v0  ;;  %417 = vmatprep.subr.mxu1 %v476_v0  ;;  %v499_v4 = vld [vmem:[%s732_s2 + $0x60] sm:$0xff]  ;;  %v508_v5 = vld [vmem:[%s732_s2 + $0x58] sm:$0xff]  ;;  %v517_v6 = vld [vmem:[%s732_s2 + $0x50] sm:$0xff] }
   0x3   :  { %362 = vmatpush3.msra.mxu0 %v476_v0  ;;  %433 = vmatpush3.msra.mxu1 %v476_v0  ;;  %v526_v7 = vld [vmem:[%s732_s2 + $0x48] sm:$0xff]  ;;  %v535_v8 = vld [vmem:[%s732_s2 + $0x40] sm:$0xff]  ;;  %v544_v9 = vld [vmem:[%s732_s2 + $0x38] sm:$0xff] }
   0x4   :  { %363 = vmatprep.subr.mxu0 %v481_v1  ;;  %418 = vmatprep.subr.mxu1 %v481_v1  ;;  %v553_v10 = vld [vmem:[%s732_s2 + $0x30] sm:$0xff]  ;;  %v562_v11 = vld [vmem:[%s732_s2 + $0x28] sm:$0xff]  ;;  %v571_v12 = vld [vmem:[%s732_s2 + $0x20] sm:$0xff] }
   0x5   :  { %364 = vmatpush3.msra.mxu0 %v481_v1  ;;  %434 = vmatpush3.msra.mxu1 %v481_v1  ;;  %v580_v13 = vld [vmem:[%s732_s2 + $0x18] sm:$0xff]  ;;  %v589_v14 = vld [vmem:[%s732_s2 + $0x10] sm:$0xff]  ;;  %v598_v15 = vld [vmem:[%s732_s2 + $0x8] sm:$0xff] }
   0x6   :  { %365 = vmatprep.subr.mxu0 %v490_v3  ;;  %419 = vmatprep.subr.mxu1 %v490_v3  ;;  %v607_v16 = vld [vmem:[%s732_s2] sm:$0xff]  ;;  %v31_v19 = vld [vmem:[%s733_s0 + $0x8] sm:$0xff]  ;;  %v32_v21 = vld [vmem:[%s733_s0 + $0x10] sm:$0xff] }
   0x7   :  { %366 = vmatpush3.msra.mxu0 %v490_v3  ;;  %435 = vmatpush3.msra.mxu1 %v490_v3  ;;  %v30_v17 = vld [vmem:[%s733_s0] sm:$0xff]  ;;  %v39_v20 = vld [vmem:[%s733_s0 + $0x48] sm:$0xff]  ;;  %v40_v22 = vld [vmem:[%s733_s0 + $0x50] sm:$0xff] }
   0x8   :  { %367 = vmatprep.subr.mxu0 %v499_v4  ;;  %420 = vmatprep.subr.mxu1 %v499_v4  ;;  %v38_v18 = vld [vmem:[%s733_s0 + $0x40] sm:$0xff]  ;;  %v48_v24 = vld [vmem:[%s734_s1 + $0x10] sm:$0xff]  ;;  %v33_v25 = vld [vmem:[%s733_s0 + $0x18] sm:$0xff] }
   0x9   :  { %368 = vmatpush3.msra.mxu0 %v499_v4  ;;  %436 = vmatpush3.msra.mxu1 %v499_v4  ;;  %v46_v23 = vld [vmem:[%s734_s1] sm:$0xff]  ;;  %v41_v26 = vld [vmem:[%s733_s0 + $0x58] sm:$0xff]  ;;  %v47_v29 = vld [vmem:[%s734_s1 + $0x8] sm:$0xff] }
   0xa   :  { %369 = vmatprep.subr.mxu0 %v508_v5  ;;  %421 = vmatprep.subr.mxu1 %v508_v5  ;;  %v34_v27 = vld [vmem:[%s733_s0 + $0x20] sm:$0xff]  ;;  %v49_v30 = vld [vmem:[%s734_s1 + $0x18] sm:$0xff]  ;;  %v35_v31 = vld [vmem:[%s733_s0 + $0x28] sm:$0xff] }
   0xb   :  { %370 = vmatpush3.msra.mxu0 %v508_v5  ;;  %437 = vmatpush3.msra.mxu1 %v508_v5  ;;  %v42_v28 = vld [vmem:[%s733_s0 + $0x60] sm:$0xff]  ;;  %v43_v32 = vld [vmem:[%s733_s0 + $0x68] sm:$0xff]  ;;  %v36_v33 = vld [vmem:[%s733_s0 + $0x30] sm:$0xff] }
   0xc   :  { %371 = vmatprep.subr.mxu0 %v517_v6  ;;  %422 = vmatprep.subr.mxu1 %v517_v6  ;;  %v44_v34 = vld [vmem:[%s733_s0 + $0x70] sm:$0xff]  ;;  %v50_v35 = vld [vmem:[%s734_s1 + $0x20] sm:$0xff]  ;;  %v51_v36 = vld [vmem:[%s734_s1 + $0x28] sm:$0xff] }
   0xd   :  { %372 = vmatpush3.msra.mxu0 %v517_v6  ;;  %438 = vmatpush3.msra.mxu1 %v517_v6  ;;  %v37_v37 = vld [vmem:[%s733_s0 + $0x38] sm:$0xff]  ;;  %v52_v39 = vld [vmem:[%s734_s1 + $0x30] sm:$0xff]  ;;  %v54_v41 = vld [vmem:[%s734_s1 + $0x40] sm:$0xff] }
   0xe   :  { %373 = vmatprep.subr.mxu0 %v526_v7  ;;  %423 = vmatprep.subr.mxu1 %v526_v7  ;;  %v45_v38 = vld [vmem:[%s733_s0 + $0x78] sm:$0xff]  ;;  %v55_v42 = vld [vmem:[%s734_s1 + $0x48] sm:$0xff]  ;;  %v56_v43 = vld [vmem:[%s734_s1 + $0x50] sm:$0xff] }
   0xf   :  { %374 = vmatpush3.msra.mxu0 %v526_v7  ;;  %439 = vmatpush3.msra.mxu1 %v526_v7  ;;  %v53_v40 = vld [vmem:[%s734_s1 + $0x38] sm:$0xff]  ;;  %v58_v45 = vld [vmem:[%s734_s1 + $0x60] sm:$0xff]  ;;  %v59_v46 = vld [vmem:[%s734_s1 + $0x68] sm:$0xff] }
  0x10   :  { %375 = vmatprep.subr.mxu0 %v535_v8  ;;  %424 = vmatprep.subr.mxu1 %v535_v8  ;;  %v57_v44 = vld [vmem:[%s734_s1 + $0x58] sm:$0xff]  ;;  %v60_v47 = vld [vmem:[%s734_s1 + $0x70] sm:$0xff] }
  0x11   :  { %376 = vmatpush3.msra.mxu0 %v535_v8  ;;  %440 = vmatpush3.msra.mxu1 %v535_v8  ;;  %v61_v48 = vld [vmem:[%s734_s1 + $0x78] sm:$0xff] }
  0x12   :  { %377 = vmatprep.subr.mxu0 %v544_v9  ;;  %425 = vmatprep.subr.mxu1 %v544_v9 }
  0x13   :  { %378 = vmatpush3.msra.mxu0 %v544_v9  ;;  %441 = vmatpush3.msra.mxu1 %v544_v9 }
  0x14   :  { %379 = vmatprep.subr.mxu0 %v553_v10  ;;  %426 = vmatprep.subr.mxu1 %v553_v10 }
  0x15   :  { %380 = vmatpush3.msra.mxu0 %v553_v10  ;;  %442 = vmatpush3.msra.mxu1 %v553_v10 }
  0x16   :  { %381 = vmatprep.subr.mxu0 %v562_v11  ;;  %427 = vmatprep.subr.mxu1 %v562_v11 }
  0x17   :  { %382 = vmatpush3.msra.mxu0 %v562_v11  ;;  %443 = vmatpush3.msra.mxu1 %v562_v11 }
  0x18   :  { %383 = vmatprep.subr.mxu0 %v571_v12  ;;  %428 = vmatprep.subr.mxu1 %v571_v12 }
  0x19   :  { %384 = vmatpush3.msra.mxu0 %v571_v12  ;;  %444 = vmatpush3.msra.mxu1 %v571_v12 }
  0x1a   :  { %385 = vmatprep.subr.mxu0 %v580_v13  ;;  %429 = vmatprep.subr.mxu1 %v580_v13 }
  0x1b   :  { %386 = vmatpush3.msra.mxu0 %v580_v13  ;;  %445 = vmatpush3.msra.mxu1 %v580_v13 }
  0x1c   :  { %387 = vmatprep.subr.mxu0 %v589_v14  ;;  %430 = vmatprep.subr.mxu1 %v589_v14 }
  0x1d   :  { %388 = vmatpush3.msra.mxu0 %v589_v14  ;;  %446 = vmatpush3.msra.mxu1 %v589_v14 }
  0x1e   :  { %389 = vmatprep.subr.mxu0 %v598_v15  ;;  %431 = vmatprep.subr.mxu1 %v598_v15 }
  0x1f   :  { %390 = vmatpush3.msra.mxu0 %v598_v15  ;;  %447 = vmatpush3.msra.mxu1 %v598_v15 }
  0x20   :  { %391 = vmatprep.subr.mxu0 %v607_v16  ;;  %432 = vmatprep.subr.mxu1 %v607_v16 }
  0x21   :  { %392 = vmatpush3.msra.mxu0 %v607_v16  ;;  %448 = vmatpush3.msra.mxu1 %v607_v16 }
  0x22   :  { %393 = vmatprep.mubr.f32.mxu0 %v30_v17  ;;  %405 = vmatprep.mubr.f32.mxu1 %v38_v18 }
  0x23   :  { %394 = vmatmul.mubr.f32.vlgmr.msra.gmra.mxu0 %v31_v19  ;;  %406 = vmatmul.mubr.f32.vlgmr.msra.gmra.mxu1 %v39_v20 }
  0x24   :  { %396 = vmatprep.mubr.f32.mxu0 %v32_v21  ;;  %408 = vmatprep.mubr.f32.mxu1 %v40_v22 }
  0x25   :  { %64 = vperm.xlu0 %450, %v46_v23   ;;  %74 = vperm.xlu1 %451, %v48_v24  }
  0x27   :  { %397 = vmatmul.mubr.f32.gmra.mxu0 %v33_v25  ;;  %409 = vmatmul.mubr.f32.gmra.mxu1 %v41_v26 }
  0x28   :  { %399 = vmatprep.mubr.f32.mxu0 %v34_v27  ;;  %411 = vmatprep.mubr.f32.mxu1 %v42_v28 }
  0x29   :  { %69 = vperm.xlu0 %450, %v47_v29   ;;  %79 = vperm.xlu1 %451, %v49_v30  }
  0x2b   :  { %400 = vmatmul.mubr.f32.gmra.mxu0 %v35_v31  ;;  %412 = vmatmul.mubr.f32.gmra.mxu1 %v43_v32 }
  0x2c   :  { %402 = vmatprep.mubr.f32.mxu0 %v36_v33  ;;  %414 = vmatprep.mubr.f32.mxu1 %v44_v34 }
  0x2d   :  { %84 = vperm.xlu0 %450, %v50_v35   ;;  %89 = vperm.xlu1 %451, %v51_v36  }
  0x2f   :  { %403 = vmatmul.mubr.f32.gmra.mxu0 %v37_v37  ;;  %415 = vmatmul.mubr.f32.gmra.mxu1 %v45_v38 }
  0x31   :  { %94 = vperm.xlu0 %450, %v52_v39   ;;  %99 = vperm.xlu1 %451, %v53_v40  }
  0x35   :  { %104 = vperm.xlu0 %450, %v54_v41   ;;  %109 = vperm.xlu1 %451, %v55_v42  }
  0x39   :  { %114 = vperm.xlu0 %450, %v56_v43   ;;  %119 = vperm.xlu1 %451, %v57_v44  }
  0x3d   :  { %124 = vperm.xlu0 %450, %v58_v45   ;;  %129 = vperm.xlu1 %451, %v59_v46  }
  0x41   :  { %134 = vperm.xlu0 %450, %v60_v47   ;;  %139 = vperm.xlu1 %451, %v61_v48  }
  0xa0   :  { %v65_v49 = vpop.permute.xlu0 %64  ;;  %v75_v50 = vpop.permute.xlu1 %74 }
  0xa4   :  { %v70_v51 = vpop.permute.xlu0 %69  ;;  %v80_v52 = vpop.permute.xlu1 %79 }
  0xa8   :  { %v85_v53 = vpop.permute.xlu0 %84  ;;  %v90_v54 = vpop.permute.xlu1 %89 }
  0xac   :  { %v95_v59 = vpop.permute.xlu0 %94  ;;  %v100_v63 = vpop.permute.xlu1 %99 }
  0xb0   :  { %v105_v23 = vpop.permute.xlu0 %104  ;;  %v110_v32 = vpop.permute.xlu1 %109 }
  0xb4   :  { %v120_v42 = vpop.permute.xlu1 %119 }
  0xe3   :  { %v395_v55 = vpop.f32.mrf.mxu0  ;;  %v407_v56 = vpop.f32.mrf.mxu1 }
  0xe4   :  { %v214_v60 = vadd.f32 %v395_v55, %v70_v51  ;;  %v254_v44 = vadd.f32 %v407_v56, %v110_v32 }
  0xe5   :  { %v208_v57 = vpop.f32.mrf.mxu0  ;;  %v248_v58 = vpop.f32.mrf.mxu1 }
  0xe6   :  { %v209_v61 = vadd.f32 %v208_v57, %v65_v49  ;;  %v288_v19 = vmul.f32 %v214_v60, %v598_v15  ;;  %v249_v40 = vadd.f32 %v248_v58, %v105_v23 }
  0xe7   :  { %v398_v62 = vpop.f32.mrf.mxu0  ;;  %v410_v17 = vpop.f32.mrf.mxu1 }
  0xe8   :  { %v287_v2 = vmul.f32 %v209_v61, %v607_v16  ;;  %v224_v20 = vadd.f32 %v398_v62, %v80_v52  ;;  %v264_v51 = vadd.f32 %v410_v17, %v120_v42 }
  0xe9   :  { %v218_v18 = vpop.f32.mrf.mxu0  ;;  %v258_v26 = vpop.f32.mrf.mxu1 }
  0xea   :  { %v219_v21 = vadd.f32 %v218_v18, %v75_v50  ;;  %v303_v24 = vadd.f32 %v288_v19, %v287_v2  ;;  %v290_v28 = vmul.f32 %v224_v20, %v580_v13  ;;  %v296_v50 = vmul.f32 %v254_v44, %v526_v7 }
  0xeb   :  { %v401_v22 = vpop.f32.mrf.mxu0  ;;  %v413_v15 = vpop.f32.mrf.mxu1  ;;  %v298_v56 = vmul.f32 %v264_v51, %v508_v5 }
  0xec   :  { %v289_v25 = vmul.f32 %v219_v21, %v589_v14  ;;  %v234_v30 = vadd.f32 %v401_v22, %v90_v54  ;;  %v115_v14 = vpop.permute.xlu0 %114 }
  0xed   :  { %v228_v27 = vpop.f32.mrf.mxu0  ;;  %v268_v43 = vpop.f32.mrf.mxu1  ;;  %v259_v47 = vadd.f32 %v258_v26, %v115_v14 }
  0xee   :  { %v304_v29 = vadd.f32 %v303_v24, %v289_v25  ;;  %v229_v31 = vadd.f32 %v228_v27, %v85_v53  ;;  %v292_v36 = vmul.f32 %v234_v30, %v562_v11  ;;  %v130_v53 = vpop.permute.xlu1 %129 }
  0xef   :  { %v404_v16 = vpop.f32.mrf.mxu0  ;;  %v416_v11 = vpop.f32.mrf.mxu1 }
  0xf0   :  { %v291_v33 = vmul.f32 %v229_v31, %v571_v12  ;;  %v305_v34 = vadd.f32 %v304_v29, %v290_v28  ;;  %v244_v38 = vadd.f32 %v404_v16, %v100_v63  ;;  %v295_v12 = vmul.f32 %v249_v40, %v535_v8  ;;  %v125_v49 = vpop.permute.xlu0 %124 }
  0xf1   :  { %v238_v35 = vpop.f32.mrf.mxu0  ;;  %v269_v54 = vadd.f32 %v268_v43, %v125_v49  ;;  %v278_v57 = vpop.f32.mrf.mxu1 }
  0xf2   :  { %v306_v37 = vadd.f32 %v305_v34, %v291_v33  ;;  %v239_v39 = vadd.f32 %v238_v35, %v95_v59  ;;  %v294_v45 = vmul.f32 %v244_v38, %v544_v9  ;;  %v274_v9 = vadd.f32 %v413_v15, %v130_v53  ;;  %v140_v62 = vpop.permute.xlu1 %139 }
  0xf3   :  { %v299_v8 = vmul.f32 %v269_v54, %v499_v4  ;;  %v284_v63 = vadd.f32 %v416_v11, %v140_v62 }
  0xf4   :  { %v293_v41 = vmul.f32 %v239_v39, %v553_v10  ;;  %v307_v13 = vadd.f32 %v306_v37, %v292_v36  ;;  %v297_v10 = vmul.f32 %v259_v47, %v517_v6  ;;  %v135_v59 = vpop.permute.xlu0 %134  ;;  %v300_v7 = vmul.f32 %v274_v9, %v490_v3 }
  0xf5   :  { %v279_v60 = vadd.f32 %v278_v57, %v135_v59  ;;  %v302_v18 = vmul.f32 %v284_v63, %v476_v0 }
  0xf6   :  { %v308_v46 = vadd.f32 %v307_v13, %v293_v41 }
  0xf7   :  { %v301_v17 = vmul.f32 %v279_v60, %v481_v1 }
  0xf8   :  { %v309_v48 = vadd.f32 %v308_v46, %v294_v45 }
  0xfa   :  { %v310_v52 = vadd.f32 %v309_v48, %v295_v12 }
  0xfc   :  { %v311_v55 = vadd.f32 %v310_v52, %v296_v50 }
  0xfe   :  { %v312_v58 = vadd.f32 %v311_v55, %v297_v10 }
 0x100   :  { %v313_v61 = vadd.f32 %v312_v58, %v298_v56 }
 0x102   :  { %v314_v2 = vadd.f32 %v313_v61, %v299_v8 }
 0x104   :  { %v315_v6 = vadd.f32 %v314_v2, %v300_v7 }
 0x106   :  { %v316_v19 = vadd.f32 %v315_v6, %v301_v17 }
 0x108   :  { %v317_v20 = vadd.f32 %v316_v19, %v302_v18 }
 0x10a   :  { %v318_v5 = vrot.slane %v317_v20, 4 }
 0x10c   :  { %v319_v21 = vadd.f32 %v318_v5, %v317_v20 }
 0x10e   :  { %v320_v22 = vrot.slane %v319_v21, 2 }
 0x110   :  { %v321_v23 = vadd.f32 %v320_v22, %v319_v21 }
 0x112   :  { %v322_v24 = vrot.slane %v321_v23, 1 }
 0x114   :  { %v323_v4 = vadd.f32 %v322_v24, %v321_v23 }
 0x116   :  { %324 = vst [vmem:[%s735_s3] sm:$0x1] %v323_v4 }

</bundles_post_ra>
